<compile_context>
chip_gen: v7x
topology: tpu7x:2x2x1
jax: 0.10.0
libtpu: 0.0.40
codegen_flags: <defaults>
</compile_context>

<pallas_src>
import functools

import jax
import jax.numpy as jnp
from jax.experimental import pallas as pl


def _encoder_kernel(x_ref, m1_ref, m2_ref,
                    wh1_ref, bh1_ref, wg1_ref, bg1_ref,
                    wh2_ref, bh2_ref, wg2_ref, bg2_ref,
                    whead_ref, bhead_ref,
                    out_ref, *, S, latent, compute_dtype):
    def matmul(a, w_ref):
        return jnp.dot(a.astype(compute_dtype),
                       w_ref[...].astype(compute_dtype),
                       preferred_element_type=jnp.float32)

    x = x_ref[...]

    # --- GatedDense #1: identical for every ensemble member (dropout comes
    # after the gate), so compute it once on the [B, n_dims] input.
    h1 = matmul(x, wh1_ref) + bh1_ref[...]
    g1 = jax.nn.sigmoid(matmul(x, wg1_ref) + bg1_ref[...])
    y1 = h1 * g1                                            # [B, h1]

    # Stack the S members along rows (s-major) and apply the pre-scaled
    # per-member dropout masks.  Sublane concat is a clean, supported op.
    y1_all = jnp.concatenate([y1] * S, axis=0)              # [S*B, h1]
    a1 = y1_all * m1_ref[...]

    # --- GatedDense #2 on all members at once: one matmul per weight matrix.
    h2 = matmul(a1, wh2_ref) + bh2_ref[...]
    g2 = jax.nn.sigmoid(matmul(a1, wg2_ref) + bg2_ref[...])
    a2 = (h2 * g2) * m2_ref[...]                            # [S*B, h2]

    # --- Fused heads: Whead = [Wmu | Wlogvar] -> packed [mu | std] slab.
    head = matmul(a2, whead_ref) + bhead_ref[...]           # [S*B, 2L]
    col = jax.lax.broadcasted_iota(jnp.int32, head.shape, 1)
    std = jnp.exp(0.5 * jnp.clip(head, -6.0, 2.0))          # Hardtanh(-6,2), exp(0.5*)
    out_ref[...] = jnp.where(col >= latent, std, head)      # [mu | std]


def _dropout_masks(key, S, B, h1, h2, p_drop):
    """Fresh train-mode dropout mask per ensemble member, pre-scaled by 1/(1-p)."""
    keep = 1.0 - p_drop
    k1, k2 = jax.random.split(key)
    m1 = jax.random.bernoulli(k1, keep, (S * B, h1)).astype(jnp.float32) * (1.0 / keep)
    m2 = jax.random.bernoulli(k2, keep, (S * B, h2)).astype(jnp.float32) * (1.0 / keep)
    return m1, m2


def dropout_ensemble_encoders(x, params, key, *, S, p_drop=0.2,
                              compute_dtype=jnp.float32):
    """Returns (mu, std), each of shape [B, S, latent_dims] (PyTorch convention)."""
    B, _ = x.shape
    h1 = params["wh1"].shape[1]
    h2 = params["wh2"].shape[1]
    L = params["wmu"].shape[1]

    m1, m2 = _dropout_masks(key, S, B, h1, h2, p_drop)

    # Fuse the two heads into one [h2, 2L] weight -> one MXU issue + one
    # packed, denser output store.
    w_head = jnp.concatenate([params["wmu"], params["wlv"]], axis=1)   # [h2, 2L]
    b_head = jnp.concatenate([params["bmu"], params["blv"]], axis=1)   # [1, 2L]

    kernel = functools.partial(_encoder_kernel, S=S, latent=L,
                               compute_dtype=compute_dtype)

    # No grid: everything (a few hundred KiB) fits in VMEM in one shot; the
    # whole-array default BlockSpecs land every operand in VMEM once, so there
    # is no per-step pipeline overhead and no weight double-buffering.
    out = pl.pallas_call(
        kernel,
        out_shape=jax.ShapeDtypeStruct((S * B, 2 * L), jnp.float32),
    )(x, m1, m2,
      params["wh1"], params["bh1"], params["wg1"], params["bg1"],
      params["wh2"], params["bh2"], params["wg2"], params["bg2"],
      w_head, b_head)

    # [S*B, 2L] -> [B, S, 2L] (tiny: S*B*2L floats), then split mu / std.
    out = jnp.transpose(out.reshape(S, B, 2 * L), (1, 0, 2))
    return out[..., :L], out[..., L:]


def _reference_forward(x, params, m1, m2, S):
    """Pure-JAX reference of the PyTorch module, given fixed dropout masks."""
    B = x.shape[0]
    hi = jax.lax.Precision.HIGHEST

    def lin(a, w, b):
        return jnp.dot(a, w, precision=hi) + b

    y1 = lin(x, params["wh1"], params["bh1"]) * \
        jax.nn.sigmoid(lin(x, params["wg1"], params["bg1"]))
    m1 = m1.reshape(S, B, -1)
    m2 = m2.reshape(S, B, -1)
    mus, stds = [], []
    for s in range(S):
        a1 = y1 * m1[s]
        y2 = lin(a1, params["wh2"], params["bh2"]) * \
            jax.nn.sigmoid(lin(a1, params["wg2"], params["bg2"]))
        a2 = y2 * m2[s]
        mu = lin(a2, params["wmu"], params["bmu"])
        lv = jnp.clip(lin(a2, params["wlv"], params["blv"]), -6.0, 2.0)
        mus.append(mu)
        stds.append(jnp.exp(0.5 * lv))
    return jnp.stack(mus, axis=1), jnp.stack(stds, axis=1)     # [B, S, L]


def init_params(key, n_dims, latent_dims, h1, h2):
    """nn.Linear-style init: U(-1/sqrt(fan_in), +1/sqrt(fan_in)); weights [in, out]."""
    names_shapes = [
        ("wh1", (n_dims, h1)), ("bh1", (1, h1)),
        ("wg1", (n_dims, h1)), ("bg1", (1, h1)),
        ("wh2", (h1, h2)),     ("bh2", (1, h2)),
        ("wg2", (h1, h2)),     ("bg2", (1, h2)),
        ("wmu", (h2, latent_dims)), ("bmu", (1, latent_dims)),
        ("wlv", (h2, latent_dims)), ("blv", (1, latent_dims)),
    ]
    shape_map = dict(names_shapes)
    params = {}
    keys = jax.random.split(key, len(names_shapes))
    for k, (name, shape) in zip(keys, names_shapes):
        fan_in = shape[0] if name.startswith("w") else shape_map["w" + name[1:]][0]
        bound = 1.0 / jnp.sqrt(jnp.float32(fan_in))
        params[name] = jax.random.uniform(k, shape, jnp.float32, -bound, bound)
    return params


if __name__ == "__main__":
    # small, shape-consistent example: x is the flattened input [B, n_dims]
    B, n_dims, latent_dims, S = 8, 64, 16, 2
    h_dim_1 = h_dim_2 = 128
    p_drop = 0.2

    root = jax.random.PRNGKey(0)
    kx, kp, kd = jax.random.split(root, 3)
    x = jax.random.normal(kx, (B, n_dims), dtype=jnp.float32)
    params = init_params(kp, n_dims, latent_dims, h_dim_1, h_dim_2)

    fwd = jax.jit(functools.partial(dropout_ensemble_encoders, S=S, p_drop=p_drop))
    mu, std = fwd(x, params, kd)
    jax.block_until_ready((mu, std))

    # shape / range checks
    assert mu.shape == (B, S, latent_dims) and std.shape == (B, S, latent_dims)
    assert bool(jnp.all(jnp.isfinite(mu))) and bool(jnp.all(jnp.isfinite(std)))
    # std = exp(0.5 * hardtanh(-6, 2))  ->  bounded in [exp(-3), exp(1)]
    assert bool(jnp.all(std >= jnp.exp(-3.0) - 1e-6))
    assert bool(jnp.all(std <= jnp.exp(1.0) + 1e-5))

    # cross-check against a pure-JAX reference using the SAME dropout masks
    m1, m2 = _dropout_masks(kd, S, B, h_dim_1, h_dim_2, p_drop)
    mu_ref, std_ref = _reference_forward(x, params, m1, m2, S)
    assert bool(jnp.allclose(mu, mu_ref, rtol=2e-3, atol=2e-3))
    assert bool(jnp.allclose(std, std_ref, rtol=2e-3, atol=2e-3))

    print("KERNEL_OK")
</pallas_src>

<mosaic_0001>
module attributes {stable_mosaic.version = 11 : i64} {
  func.func @_encoder_kernel(%arg0: memref<8x64xf32, #tpu.memory_space<vmem>>, %arg1: memref<16x128xf32, #tpu.memory_space<vmem>>, %arg2: memref<16x128xf32, #tpu.memory_space<vmem>>, %arg3: memref<64x128xf32, #tpu.memory_space<vmem>>, %arg4: memref<1x128xf32, #tpu.memory_space<vmem>>, %arg5: memref<64x128xf32, #tpu.memory_space<vmem>>, %arg6: memref<1x128xf32, #tpu.memory_space<vmem>>, %arg7: memref<128x128xf32, #tpu.memory_space<vmem>>, %arg8: memref<1x128xf32, #tpu.memory_space<vmem>>, %arg9: memref<128x128xf32, #tpu.memory_space<vmem>>, %arg10: memref<1x128xf32, #tpu.memory_space<vmem>>, %arg11: memref<128x32xf32, #tpu.memory_space<vmem>>, %arg12: memref<1x32xf32, #tpu.memory_space<vmem>>, %arg13: memref<16x32xf32, #tpu.memory_space<vmem>>) attributes {dimension_semantics = [], scalar_prefetch = 0 : i64, scratch_operands = 0 : i64, tpu.core_type = #tpu.core_type<tc>} {
    %c0 = arith.constant 0 : index
    %c0_0 = arith.constant 0 : index
    %0 = vector.load %arg0[%c0, %c0_0] : memref<8x64xf32, #tpu.memory_space<vmem>>, vector<8x64xf32>
    %c0_1 = arith.constant 0 : index
    %c0_2 = arith.constant 0 : index
    %1 = vector.load %arg3[%c0_1, %c0_2] : memref<64x128xf32, #tpu.memory_space<vmem>>, vector<64x128xf32>
    %cst = arith.constant dense<0.000000e+00> : vector<8x128xf32>
    %2 = tpu.matmul %0, %1, %cst {dimension_numbers = #tpu.dot_dimension_numbers<[1], [0], [0], [1], [0, 0, 1, 1], [], []>} : vector<8x64xf32>, vector<64x128xf32>, vector<8x128xf32> -> vector<8x128xf32>
    %c0_3 = arith.constant 0 : index
    %c0_4 = arith.constant 0 : index
    %3 = vector.load %arg4[%c0_3, %c0_4] : memref<1x128xf32, #tpu.memory_space<vmem>>, vector<1x128xf32>
    %4 = vector.broadcast %3 : vector<1x128xf32> to vector<8x128xf32>
    %5 = arith.addf %2, %4 : vector<8x128xf32>
    %c0_5 = arith.constant 0 : index
    %c0_6 = arith.constant 0 : index
    %6 = vector.load %arg5[%c0_5, %c0_6] : memref<64x128xf32, #tpu.memory_space<vmem>>, vector<64x128xf32>
    %cst_7 = arith.constant dense<0.000000e+00> : vector<8x128xf32>
    %7 = tpu.matmul %0, %6, %cst_7 {dimension_numbers = #tpu.dot_dimension_numbers<[1], [0], [0], [1], [0, 0, 1, 1], [], []>} : vector<8x64xf32>, vector<64x128xf32>, vector<8x128xf32> -> vector<8x128xf32>
    %c0_8 = arith.constant 0 : index
    %c0_9 = arith.constant 0 : index
    %8 = vector.load %arg6[%c0_8, %c0_9] : memref<1x128xf32, #tpu.memory_space<vmem>>, vector<1x128xf32>
    %9 = vector.broadcast %8 : vector<1x128xf32> to vector<8x128xf32>
    %10 = arith.addf %7, %9 : vector<8x128xf32>
    %11 = arith.negf %10 : vector<8x128xf32>
    %12 = math.exp %11 : vector<8x128xf32>
    %cst_10 = arith.constant 1.000000e+00 : f32
    %13 = vector.broadcast %cst_10 : f32 to vector<8x128xf32>
    %14 = arith.addf %13, %12 : vector<8x128xf32>
    %15 = arith.divf %13, %14 : vector<8x128xf32>
    %16 = arith.mulf %5, %15 : vector<8x128xf32>
    %17 = tpu.concatenate %16, %16 in 0 : vector<8x128xf32>, vector<8x128xf32> -> vector<16x128xf32>
    %c0_11 = arith.constant 0 : index
    %c0_12 = arith.constant 0 : index
    %18 = vector.load %arg1[%c0_11, %c0_12] : memref<16x128xf32, #tpu.memory_space<vmem>>, vector<16x128xf32>
    %19 = arith.mulf %17, %18 : vector<16x128xf32>
    %c0_13 = arith.constant 0 : index
    %c0_14 = arith.constant 0 : index
    %20 = vector.load %arg7[%c0_13, %c0_14] : memref<128x128xf32, #tpu.memory_space<vmem>>, vector<128x128xf32>
    %cst_15 = arith.constant dense<0.000000e+00> : vector<16x128xf32>
    %21 = tpu.matmul %19, %20, %cst_15 {dimension_numbers = #tpu.dot_dimension_numbers<[1], [0], [0], [1], [0, 0, 1, 1], [], []>} : vector<16x128xf32>, vector<128x128xf32>, vector<16x128xf32> -> vector<16x128xf32>
    %c0_16 = arith.constant 0 : index
    %c0_17 = arith.constant 0 : index
    %22 = vector.load %arg8[%c0_16, %c0_17] : memref<1x128xf32, #tpu.memory_space<vmem>>, vector<1x128xf32>
    %23 = vector.broadcast %22 : vector<1x128xf32> to vector<16x128xf32>
    %24 = arith.addf %21, %23 : vector<16x128xf32>
    %c0_18 = arith.constant 0 : index
    %c0_19 = arith.constant 0 : index
    %25 = vector.load %arg9[%c0_18, %c0_19] : memref<128x128xf32, #tpu.memory_space<vmem>>, vector<128x128xf32>
    %cst_20 = arith.constant dense<0.000000e+00> : vector<16x128xf32>
    %26 = tpu.matmul %19, %25, %cst_20 {dimension_numbers = #tpu.dot_dimension_numbers<[1], [0], [0], [1], [0, 0, 1, 1], [], []>} : vector<16x128xf32>, vector<128x128xf32>, vector<16x128xf32> -> vector<16x128xf32>
    %c0_21 = arith.constant 0 : index
    %c0_22 = arith.constant 0 : index
    %27 = vector.load %arg10[%c0_21, %c0_22] : memref<1x128xf32, #tpu.memory_space<vmem>>, vector<1x128xf32>
    %28 = vector.broadcast %27 : vector<1x128xf32> to vector<16x128xf32>
    %29 = arith.addf %26, %28 : vector<16x128xf32>
    %30 = arith.negf %29 : vector<16x128xf32>
    %31 = math.exp %30 : vector<16x128xf32>
    %cst_23 = arith.constant 1.000000e+00 : f32
    %32 = vector.broadcast %cst_23 : f32 to vector<16x128xf32>
    %33 = arith.addf %32, %31 : vector<16x128xf32>
    %34 = arith.divf %32, %33 : vector<16x128xf32>
    %35 = arith.mulf %24, %34 : vector<16x128xf32>
    %c0_24 = arith.constant 0 : index
    %c0_25 = arith.constant 0 : index
    %36 = vector.load %arg2[%c0_24, %c0_25] : memref<16x128xf32, #tpu.memory_space<vmem>>, vector<16x128xf32>
    %37 = arith.mulf %35, %36 : vector<16x128xf32>
    %c0_26 = arith.constant 0 : index
    %c0_27 = arith.constant 0 : index
    %38 = vector.load %arg11[%c0_26, %c0_27] : memref<128x32xf32, #tpu.memory_space<vmem>>, vector<128x32xf32>
    %cst_28 = arith.constant dense<0.000000e+00> : vector<16x32xf32>
    %39 = tpu.matmul %37, %38, %cst_28 {dimension_numbers = #tpu.dot_dimension_numbers<[1], [0], [0], [1], [0, 0, 1, 1], [], []>} : vector<16x128xf32>, vector<128x32xf32>, vector<16x32xf32> -> vector<16x32xf32>
    %c0_29 = arith.constant 0 : index
    %c0_30 = arith.constant 0 : index
    %40 = vector.load %arg12[%c0_29, %c0_30] : memref<1x32xf32, #tpu.memory_space<vmem>>, vector<1x32xf32>
    %41 = vector.broadcast %40 : vector<1x32xf32> to vector<16x32xf32>
    %42 = arith.addf %39, %41 : vector<16x32xf32>
    %43 = tpu.iota {dimensions = array<i32: 1>} : vector<16x32xi32>
    %cst_31 = arith.constant -6.000000e+00 : f32
    %cst_32 = arith.constant 2.000000e+00 : f32
    %44 = vector.broadcast %cst_31 : f32 to vector<16x32xf32>
    %45 = arith.maximumf %44, %42 : vector<16x32xf32>
    %46 = vector.broadcast %cst_32 : f32 to vector<16x32xf32>
    %47 = arith.minimumf %46, %45 : vector<16x32xf32>
    %cst_33 = arith.constant 5.000000e-01 : f32
    %48 = vector.broadcast %cst_33 : f32 to vector<16x32xf32>
    %49 = arith.mulf %48, %47 : vector<16x32xf32>
    %50 = math.exp %49 : vector<16x32xf32>
    %c16_i32 = arith.constant 16 : i32
    %51 = vector.broadcast %c16_i32 : i32 to vector<16x32xi32>
    %52 = arith.cmpi sge, %43, %51 : vector<16x32xi32>
    %53 = arith.select %52, %50, %42 : vector<16x32xi1>, vector<16x32xf32>
    %c0_34 = arith.constant 0 : index
    %c0_35 = arith.constant 0 : index
    %54 = vector.load %arg13[%c0_34, %c0_35] : memref<16x32xf32, #tpu.memory_space<vmem>>, vector<16x32xf32>
    tpu.vector_store %arg13[%c0_34, %c0_35], %53 {strides = array<i32>} : memref<16x32xf32, #tpu.memory_space<vmem>>, vector<16x32xf32>,
    return
  }
}

</mosaic_0001>

<bundles_post_ra>
// kernel: dropout_ensemble_encoders.1
= control target key start
LH: loop header
LB: loop body
LE: loop exit
PB: predicated region body
PF: predicated region fallthrough
CT: control target
= control target key end

     0   :  { %18 = vsyncpa [#allocation3], 0  ;;  %s966_s25 = smov [#allocation2]   ;;  %s1281_s0 = inlined_call_operand.hbm [shape: f32[8,64], index: 0, kind: input, shape index: {}]   ;;  %s1282_s1 = inlined_call_operand.vmem [shape: f32[16,128], index: 1, kind: input, shape index: {}]   ;;  %s1283_s2 = inlined_call_operand.vmem [shape: f32[16,128], index: 2, kind: input, shape index: {}]   ;;  %s1284_s3 = inlined_call_operand.vmem [shape: f32[64,128], index: 3, kind: input, shape index: {}]   ;;  %s1285_s4 = inlined_call_operand.vmem [shape: f32[1,128], index: 4, kind: input, shape index: {}]   ;;  %s1286_s5 = inlined_call_operand.vmem [shape: f32[64,128], index: 5, kind: input, shape index: {}]   ;;  %s1287_s6 = inlined_call_operand.vmem [shape: f32[1,128], index: 6, kind: input, shape index: {}]   ;;  %s1288_s7 = inlined_call_operand.vmem [shape: f32[128,128], index: 7, kind: input, shape index: {}]   ;;  %s1289_s8 = inlined_call_operand.vmem [shape: f32[1,128], index: 8, kind: input, shape index: {}]   ;;  %s1290_s9 = inlined_call_operand.vmem [shape: f32[128,128], index: 9, kind: input, shape index: {}]   ;;  %s1291_s10 = inlined_call_operand.vmem [shape: f32[1,128], index: 10, kind: input, shape index: {}]   ;;  %s1292_s11 = inlined_call_operand.vmem [shape: f32[128,32], index: 11, kind: input, shape index: {}]   ;;  %s1293_s12 = inlined_call_operand.vmem [shape: f32[1,32], index: 12, kind: input, shape index: {}]   ;;  %s1294_s13 = inlined_call_operand.vmem [shape: f32[16,32], index: 13, kind: output, shape index: {}]  }
   0x1   :  { %s25_s26 = sshll.u32 %s966_s25, 4  ;;  %s942_s29 = scalar_lea.hbm %s1281_s0, 128  ;;  %s26_s26 = int_to_ptr.vmem [resolvable:$true] %s25_s26 }
   0x2   :  { %p943_p0 = scmp.ne.s32.totalorder %s1281_s0, %s942_s29  ;;  %p946_p1 = scmp.lt.u32.totalorder %s942_s29, %s1281_s0 }
   0x4   :  { %p948_p2 = pnand %p946_p1, %p943_p0 }
   0x6   :  { %951 = shalt.err (!%p948_p2)
}
   0x7   :  { %s952_s17 = scalar_lea.vmem %s26_s26, 128  ;;  %p957_p4 = scmp.lt.s32.totalorder %s26_s26, %s26_s26 }
   0x8   :  { %p953_p3 = scmp.ne.s32.totalorder %s26_s26, %s952_s17  ;;  %p958_p5 = scmp.lt.s32.totalorder %s952_s17, %s952_s17 }
   0xa   :  { %p959_p6 = por %p958_p5, %p957_p4 }
   0xc   :  { %p960_p7 = pnand %p959_p6, %p953_p3 }
   0xe   :  { %963 = shalt.err (!%p960_p7)
}
   0xf   :  { %28 = dma.hbm_to_vmem [thread:$0]  %s1281_s0, 128, %s26_s26, [#allocation3]  }
  0x10   :  { %964 = dma.done.wait [#allocation3], 128  }
  0x11   :  { %965 = vsyncadd [#allocation3], 4294967168  ;;  %v967_v0 = vmov 0.0|0.0   ;;  %vm968_vm0 = vmmov 0   ;;  %v969_v1 = vmov 0.0   ;;  %v57_v2 = vld [vmem:[%s1284_s3] sm:$0xff] }
  0x12   :  { %802 = vmatprep.subr.bf16.mxu1 %v967_v0  ;;  %675 = vmatprep.mubr.msk.f32.mxu1 %vm968_vm0, %v969_v1  ;;  %v58_v3 = vld [vmem:[%s1284_s3 + $0x8] sm:$0xff]  ;;  %v59_v4 = vld [vmem:[%s1284_s3 + $0x10] sm:$0xff]  ;;  %v60_v6 = vld [vmem:[%s1284_s3 + $0x18] sm:$0xff]  ;;  %vm72_vm1 = vcmask 523264   ;;  %vm569_vm3 = vcmask 261120  }
  0x13   :  { %v803_v5 = vpack.c.bf16 %v58_v3, %v57_v2  ;;  %v806_v7 = vpack.c.bf16 %v60_v6, %v59_v4  ;;  %v61_v8 = vld [vmem:[%s1284_s3 + $0x20] sm:$0xff]  ;;  %v62_v9 = vld [vmem:[%s1284_s3 + $0x28] sm:$0xff]  ;;  %v63_v11 = vld [vmem:[%s1284_s3 + $0x30] sm:$0xff] }
  0x14   :  { %v809_v10 = vpack.c.bf16 %v62_v9, %v61_v8  ;;  %v64_v12 = vld [vmem:[%s1284_s3 + $0x38] sm:$0xff]  ;;  %v146_v14 = vld [vmem:[%s1286_s5] sm:$0xff]  ;;  %v147_v15 = vld [vmem:[%s1286_s5 + $0x8] sm:$0xff] }
  0x15   :  { %804 = vmatpush3.bf16.msra.mxu1 %v803_v5  ;;  %v812_v13 = vpack.c.bf16 %v64_v12, %v63_v11  ;;  %v56_v16 = vld [vmem:[#allocation2] sm:$0xff]  ;;  %v815_v17 = vpack.c.bf16 %v147_v15, %v146_v14  ;;  %v148_v18 = vld [vmem:[%s1286_s5 + $0x10] sm:$0xff]  ;;  %v149_v19 = vld [vmem:[%s1286_s5 + $0x18] sm:$0xff] }
  0x16   :  { %805 = vmatprep.subr.bf16.mxu1 %v967_v0  ;;  %v818_v20 = vpack.c.bf16 %v149_v19, %v148_v18  ;;  %v150_v21 = vld [vmem:[%s1286_s5 + $0x20] sm:$0xff]  ;;  %v151_v22 = vld [vmem:[%s1286_s5 + $0x28] sm:$0xff]  ;;  %v152_v24 = vld [vmem:[%s1286_s5 + $0x30] sm:$0xff] }
  0x17   :  { %v821_v23 = vpack.c.bf16 %v151_v22, %v150_v21  ;;  %v153_v25 = vld [vmem:[%s1286_s5 + $0x38] sm:$0xff]  ;;  %v242_v27 = vld [vmem:[%s1288_s7] sm:$0xff]  ;;  %v243_v28 = vld [vmem:[%s1288_s7 + $0x8] sm:$0xff] }
  0x18   :  { %v824_v26 = vpack.c.bf16 %v153_v25, %v152_v24  ;;  %v340_v29 = vld [vmem:[%s1290_s9] sm:$0xff]  ;;  %v826_v30 = vpack.c.bf16 %v243_v28, %v242_v27  ;;  %v341_v31 = vld [vmem:[%s1290_s9 + $0x8] sm:$0xff]  ;;  %v244_v33 = vld [vmem:[%s1288_s7 + $0x10] sm:$0xff] }
  0x19   :  { %807 = vmatpush3.bf16.msra.mxu1 %v806_v7  ;;  %v858_v32 = vpack.c.bf16 %v341_v31, %v340_v29  ;;  %v245_v34 = vld [vmem:[%s1288_s7 + $0x18] sm:$0xff]  ;;  %v342_v35 = vld [vmem:[%s1290_s9 + $0x10] sm:$0xff]  ;;  %v246_v39 = vld [vmem:[%s1288_s7 + $0x20] sm:$0xff] }
  0x1a   :  { %808 = vmatprep.subr.bf16.mxu1 %v967_v0  ;;  %827 = vmatprep.subr.bf16.mxu0 %v826_v30  ;;  %v830_v36 = vpack.c.bf16 %v245_v34, %v244_v33  ;;  %v343_v37 = vld [vmem:[%s1290_s9 + $0x18] sm:$0xff]  ;;  %v247_v40 = vld [vmem:[%s1288_s7 + $0x28] sm:$0xff]  ;;  %v344_v41 = vld [vmem:[%s1290_s9 + $0x20] sm:$0xff] }
  0x1b   :  { %829 = vmatpush3.bf16.msra.mxu0 %v826_v30  ;;  %v862_v38 = vpack.c.bf16 %v343_v37, %v342_v35  ;;  %v834_v42 = vpack.c.bf16 %v247_v40, %v246_v39  ;;  %v345_v43 = vld [vmem:[%s1290_s9 + $0x28] sm:$0xff]  ;;  %v248_v45 = vld [vmem:[%s1288_s7 + $0x30] sm:$0xff]  ;;  %v249_v46 = vld [vmem:[%s1288_s7 + $0x38] sm:$0xff] }
  0x1c   :  { %831 = vmatprep.subr.bf16.mxu0 %v830_v36  ;;  %v866_v44 = vpack.c.bf16 %v345_v43, %v344_v41  ;;  %v346_v47 = vld [vmem:[%s1290_s9 + $0x30] sm:$0xff]  ;;  %v838_v48 = vpack.c.bf16 %v249_v46, %v248_v45  ;;  %v347_v49 = vld [vmem:[%s1290_s9 + $0x38] sm:$0xff]  ;;  %v250_v51 = vld [vmem:[%s1288_s7 + $0x40] sm:$0xff] }
  0x1d   :  { %810 = vmatpush3.bf16.msra.mxu1 %v809_v10  ;;  %v870_v50 = vpack.c.bf16 %v347_v49, %v346_v47  ;;  %v251_v52 = vld [vmem:[%s1288_s7 + $0x48] sm:$0xff]  ;;  %v348_v53 = vld [vmem:[%s1290_s9 + $0x40] sm:$0xff]  ;;  %v252_v57 = vld [vmem:[%s1288_s7 + $0x50] sm:$0xff] }
  0x1e   :  { %811 = vmatprep.subr.bf16.mxu1 %v967_v0  ;;  %v842_v54 = vpack.c.bf16 %v251_v52, %v250_v51  ;;  %v349_v55 = vld [vmem:[%s1290_s9 + $0x48] sm:$0xff]  ;;  %v253_v58 = vld [vmem:[%s1288_s7 + $0x58] sm:$0xff]  ;;  %v350_v59 = vld [vmem:[%s1290_s9 + $0x50] sm:$0xff] }
  0x1f   :  { %833 = vmatpush3.bf16.msra.mxu0 %v830_v36  ;;  %v874_v56 = vpack.c.bf16 %v349_v55, %v348_v53  ;;  %v846_v60 = vpack.c.bf16 %v253_v58, %v252_v57  ;;  %v351_v61 = vld [vmem:[%s1290_s9 + $0x58] sm:$0xff]  ;;  %v254_v62 = vld [vmem:[%s1288_s7 + $0x60] sm:$0xff]  ;;  %v255_v63 = vld [vmem:[%s1288_s7 + $0x68] sm:$0xff] }
  0x20   :  { %835 = vmatprep.subr.bf16.mxu0 %v834_v42  ;;  %v352_v2 = vld [vmem:[%s1290_s9 + $0x60] sm:$0xff]  ;;  %v353_v3 = vld [vmem:[%s1290_s9 + $0x68] sm:$0xff]  ;;  %v256_v5 = vld [vmem:[%s1288_s7 + $0x70] sm:$0xff] }
  0x21   :  { %813 = vmatpush3.bf16.msra.mxu1 %v812_v13  ;;  %v882_v4 = vpack.c.bf16 %v353_v3, %v352_v2  ;;  %v257_v6 = vld [vmem:[%s1288_s7 + $0x78] sm:$0xff]  ;;  %v354_v7 = vld [vmem:[%s1290_s9 + $0x70] sm:$0xff]  ;;  %v579_v13 = vld [vmem:[%s1287_s6] ss:$0 sm:$0xff] }
  0x22   :  { %814 = vmatprep.subr.bf16.mxu1 %v967_v0  ;;  %v355_v8 = vld [vmem:[%s1290_s9 + $0x78] sm:$0xff]  ;;  %v854_v9 = vpack.c.bf16 %v257_v6, %v256_v5  ;;  %v239_v24 = vld [vmem:[%s1282_s1 + $0x8] sm:$0xff]  ;;  %v456_v28 = vld [vmem:[%s1292_s11] sm:$0xff] }
  0x23   :  { %837 = vmatpush3.bf16.msra.mxu0 %v834_v42  ;;  %v886_v10 = vpack.c.bf16 %v355_v8, %v354_v7  ;;  %v457_v29 = vld [vmem:[%s1292_s11 + $0x8] sm:$0xff]  ;;  %v458_v31 = vld [vmem:[%s1292_s11 + $0x10] sm:$0xff]  ;;  %v460_v34 = vld [vmem:[%s1292_s11 + $0x20] sm:$0xff] }
  0x24   :  { %676 = vmatmul.mubr.msk.f32.vlgmr.msra.gmra.mrb[0].mxu1 %vm72_vm1, %v56_v16  ;;  %839 = vmatprep.subr.bf16.mxu0 %v838_v48  ;;  %v890_v30 = vpack.c.bf16 %v457_v29, %v456_v28  ;;  %v461_v35 = vld [vmem:[%s1292_s11 + $0x28] sm:$0xff]  ;;  %v462_v37 = vld [vmem:[%s1292_s11 + $0x30] sm:$0xff]  ;;  %v464_v40 = vld [vmem:[%s1292_s11 + $0x40] sm:$0xff] }
  0x25   :  { %816 = vmatpush3.bf16.msra.mxu1 %v815_v17  ;;  %694 = vmatprep.mubr.msk.f32.mxu1 %vm968_vm0, %v969_v1  ;;  %v850_v1 = vpack.c.bf16 %v255_v63, %v254_v62  ;;  %v898_v36 = vpack.c.bf16 %v461_v35, %v460_v34  ;;  %v465_v41 = vld [vmem:[%s1292_s11 + $0x48] sm:$0xff]  ;;  %v466_v43 = vld [vmem:[%s1292_s11 + $0x50] sm:$0xff]  ;;  %v468_v45 = vld [vmem:[%s1292_s11 + $0x60] sm:$0xff] }
  0x26   :  { %817 = vmatprep.subr.bf16.mxu1 %v967_v0  ;;  %v906_v42 = vpack.c.bf16 %v465_v41, %v464_v40  ;;  %v469_v47 = vld [vmem:[%s1292_s11 + $0x68] sm:$0xff]  ;;  %v470_v49 = vld [vmem:[%s1292_s11 + $0x70] sm:$0xff]  ;;  %v583_v52 = vld [vmem:[%s1291_s10] ss:$0 sm:$0xff] }
  0x27   :  { %841 = vmatpush3.bf16.msra.mxu0 %v838_v48  ;;  %v914_v48 = vpack.c.bf16 %v469_v47, %v468_v45  ;;  %v452_v6 = vld [vmem:[%s1283_s2] sm:$0xff] }
  0x28   :  { %843 = vmatprep.subr.bf16.mxu0 %v842_v54 }
  0x29   :  { %819 = vmatpush3.bf16.msra.mxu1 %v818_v20  ;;  %v577_v20 = vld [vmem:[%s1285_s4] ss:$0 sm:$0xff] }
  0x2a   :  { %820 = vmatprep.subr.bf16.mxu1 %v967_v0 }
  0x2b   :  { %845 = vmatpush3.bf16.msra.mxu0 %v842_v54 }
  0x2c   :  { %847 = vmatprep.subr.bf16.mxu0 %v846_v60 }
  0x2d   :  { %822 = vmatpush3.bf16.msra.mxu1 %v821_v23  ;;  %v238_v23 = vld [vmem:[%s1282_s1] sm:$0xff] }
  0x2e   :  { %823 = vmatprep.subr.bf16.mxu1 %v967_v0  ;;  %v878_v0 = vpack.c.bf16 %v351_v61, %v350_v59 }
  0x2f   :  { %849 = vmatpush3.bf16.msra.mxu0 %v846_v60 }
  0x30   :  { %851 = vmatprep.subr.bf16.mxu0 %v850_v1 }
  0x31   :  { %825 = vmatpush3.bf16.msra.mxu1 %v824_v26 }
  0x32   :  { %859 = vmatprep.subr.bf16.mxu1 %v858_v32 }
  0x33   :  { %853 = vmatpush3.bf16.msra.mxu0 %v850_v1  ;;  %v582_v1 = vld [vmem:[%s1289_s8] ss:$0 sm:$0xff] }
  0x34   :  { %695 = vmatmul.mubr.msk.f32.vlgmr.msra.gmra.mrb[2].mxu1 %vm72_vm1, %v56_v16  ;;  %855 = vmatprep.subr.bf16.mxu0 %v854_v9 }
  0x35   :  { %861 = vmatpush3.bf16.msra.mxu1 %v858_v32  ;;  %v459_v32 = vld [vmem:[%s1292_s11 + $0x18] sm:$0xff] }
  0x36   :  { %863 = vmatprep.subr.bf16.mxu1 %v862_v38  ;;  %v894_v33 = vpack.c.bf16 %v459_v32, %v458_v31 }
  0x37   :  { %857 = vmatpush3.bf16.msra.mxu0 %v854_v9  ;;  %v453_v9 = vld [vmem:[%s1283_s2 + $0x8] sm:$0xff] }
  0x38   :  { %891 = vmatprep.subr.bf16.mxu0 %v890_v30 }
  0x39   :  { %865 = vmatpush3.bf16.msra.mxu1 %v862_v38  ;;  %v463_v38 = vld [vmem:[%s1292_s11 + $0x38] sm:$0xff] }
  0x3a   :  { %867 = vmatprep.subr.bf16.mxu1 %v866_v44  ;;  %v902_v39 = vpack.c.bf16 %v463_v38, %v462_v37 }
  0x3d   :  { %869 = vmatpush3.bf16.msra.mxu1 %v866_v44  ;;  %v467_v44 = vld [vmem:[%s1292_s11 + $0x58] sm:$0xff] }
  0x3e   :  { %871 = vmatprep.subr.bf16.mxu1 %v870_v50  ;;  %v910_v46 = vpack.c.bf16 %v467_v44, %v466_v43 }
  0x41   :  { %873 = vmatpush3.bf16.msra.mxu1 %v870_v50  ;;  %v471_v50 = vld [vmem:[%s1292_s11 + $0x78] sm:$0xff] }
  0x42   :  { %875 = vmatprep.subr.bf16.mxu1 %v874_v56  ;;  %v918_v51 = vpack.c.bf16 %v471_v50, %v470_v49 }
  0x45   :  { %877 = vmatpush3.bf16.msra.mxu1 %v874_v56 }
  0x46   :  { %879 = vmatprep.subr.bf16.mxu1 %v878_v0 }
  0x49   :  { %881 = vmatpush3.bf16.msra.mxu1 %v878_v0 }
  0x4a   :  { %883 = vmatprep.subr.bf16.mxu1 %v882_v4 }
  0x4d   :  { %885 = vmatpush3.bf16.msra.mxu1 %v882_v4 }
  0x4e   :  { %887 = vmatprep.subr.bf16.mxu1 %v886_v10 }
  0x51   :  { %889 = vmatpush3.bf16.msra.mxu1 %v886_v10 }
  0xf7   :  { %v142_v11 = vpop.f32.mrb[0].mxu1 }
  0xf8   :  { %v677_v12 = vpop.f32.mrb[1].mxu1  ;;  %v143_v21 = vadd.f32 %v577_v20, %v142_v11 }
  0xf9   :  { %v586_v12 = vld [vmem:[%s1293_s12] ss:$0 sm:$0xff] }
 0x107   :  { %v227_v14 = vpop.f32.mrb[2].mxu1 }
 0x108   :  { %v228_v15 = vadd.f32 %v579_v13, %v227_v14  ;;  %v696_v16 = vpop.f32.mrb[3].mxu1 }
 0x10a   :  { %v581_v17 = vmul.f32 -1.442695, %v228_v15 }
 0x10c   :  { %926 = vpow2.f32 %v581_v17 }
 0x116   :  { %v927_v18 = vpop.eup %926 }
 0x117   :  { %v234_v19 = vadd.f32 1.0, %v927_v18 }
 0x119   :  { %928 = vrcp.f32 %v234_v19 }
 0x123   :  { %v929_v22 = vpop.eup %928 }
 0x124   :  { %v237_v25 = vmul.f32 %v929_v22, %v143_v21 }
 0x126   :  { %v240_v26 = vmul.f32 %v238_v23, %v237_v25  ;;  %v241_v27 = vmul.f32 %v239_v24, %v237_v25  ;;  %v554_v25 = vlaneseq }
 0x128   :  { %729 = vmatprep.mubr.f32.mxu0 %v240_v26  ;;  %764 = vmatprep.mubr.f32.mxu1 %v240_v26  ;;  %v555_v26 = vand.u32 127, %v554_v25 }
 0x129   :  { %730 = vmatmul.mubr.f32.vlgmr.msra.gmra.mrb[0].mxu0 %v241_v27  ;;  %765 = vmatmul.mubr.f32.vlgmr.msra.gmra.mrb[4].mxu1 %v241_v27 }
 0x12a   :  { %893 = vmatpush3.bf16.msra.mxu0 %v890_v30  ;;  %vm566_vm2 = vcmp.ge.s32.totalorder %v555_v26, 16 }
 0x12b   :  { %895 = vmatprep.subr.bf16.mxu0 %v894_v33 }
 0x12e   :  { %897 = vmatpush3.bf16.msra.mxu0 %v894_v33 }
 0x12f   :  { %899 = vmatprep.subr.bf16.mxu0 %v898_v36 }
 0x132   :  { %901 = vmatpush3.bf16.msra.mxu0 %v898_v36 }
 0x133   :  { %903 = vmatprep.subr.bf16.mxu0 %v902_v39 }
 0x136   :  { %905 = vmatpush3.bf16.msra.mxu0 %v902_v39 }
 0x137   :  { %907 = vmatprep.subr.bf16.mxu0 %v906_v42 }
 0x13a   :  { %909 = vmatpush3.bf16.msra.mxu0 %v906_v42 }
 0x13b   :  { %911 = vmatprep.subr.bf16.mxu0 %v910_v46 }
 0x13e   :  { %913 = vmatpush3.bf16.msra.mxu0 %v910_v46 }
 0x13f   :  { %915 = vmatprep.subr.bf16.mxu0 %v914_v48 }
 0x142   :  { %917 = vmatpush3.bf16.msra.mxu0 %v914_v48 }
 0x143   :  { %919 = vmatprep.subr.bf16.mxu0 %v918_v51 }
 0x146   :  { %921 = vmatpush3.bf16.msra.mxu0 %v918_v51 }
 0x1fc   :  { %v731_v53 = vpop.f32.mrb[0].mxu0  ;;  %v766_v54 = vpop.f32.mrb[4].mxu1 }
 0x1fd   :  { %v435_v55 = vadd.f32 %v766_v54, %v583_v52  ;;  %v331_v56 = vpop.f32.mrb[1].mxu0  ;;  %v429_v57 = vpop.f32.mrb[5].mxu1  ;;  %v337_v2 = vadd.f32 %v731_v53, %v582_v1 }
 0x1fe   :  { %v430_v58 = vadd.f32 %v583_v52, %v429_v57  ;;  %v332_v4 = vadd.f32 %v582_v1, %v331_v56 }
 0x1ff   :  { %v585_v59 = vmul.f32 -1.442695, %v435_v55 }
 0x200   :  { %v584_v60 = vmul.f32 -1.442695, %v430_v58 }
 0x201   :  { %930 = vpow2.f32 %v585_v59 }
 0x202   :  { %932 = vpow2.f32 %v584_v60 }
 0x20b   :  { %v931_v61 = vpop.eup %930 }
 0x20c   :  { %v933_v62 = vpop.eup %932  ;;  %v445_v63 = vadd.f32 1.0, %v931_v61 }
 0x20d   :  { %v444_v0 = vadd.f32 1.0, %v933_v62 }
 0x20e   :  { %934 = vrcp.f32 %v445_v63 }
 0x20f   :  { %936 = vrcp.f32 %v444_v0 }
 0x218   :  { %v935_v3 = vpop.eup %934 }
 0x219   :  { %v937_v5 = vpop.eup %936  ;;  %v451_v7 = vmul.f32 %v935_v3, %v337_v2 }
 0x21a   :  { %v450_v8 = vmul.f32 %v937_v5, %v332_v4 }
 0x21b   :  { %v455_v11 = vmul.f32 %v453_v9, %v451_v7 }
 0x21c   :  { %v454_v10 = vmul.f32 %v452_v6, %v450_v8 }
 0x21e   :  { %799 = vmatprep.mubr.f32.mxu0 %v454_v10 }
 0x21f   :  { %800 = vmatmul.mubr.f32.vlgmr.msra.gmra.mrb[2].mxu0 %v455_v11 }
 0x2f2   :  { %v801_v13 = vpop.f32.mrb[2].mxu0 }
 0x2f3   :  { %v551_v14 = vadd.f32 %v801_v13, %v586_v12  ;;  %v545_v15 = vpop.f32.mrb[3].mxu0 }
 0x2f4   :  { %v546_v16 = vadd.f32 %v586_v12, %v545_v15 }
 0x2f5   :  { %v557_v17 = vmax.f32 %v551_v14, -6.0 }
 0x2f6   :  { %v556_v18 = vmax.f32 %v546_v16, -6.0 }
 0x2f7   :  { %v559_v19 = vmin.f32 %v557_v17, 2.0 }
 0x2f8   :  { %v558_v20 = vmin.f32 %v556_v18, 2.0 }
 0x2f9   :  { %v561_v21 = vmul.f32 0.5, %v559_v19 }
 0x2fa   :  { %v560_v22 = vmul.f32 0.5, %v558_v20 }
 0x2fb   :  { %v564_v23 = vmul.f32 1.442695, %v561_v21 }
 0x2fc   :  { %v562_v24 = vmul.f32 1.442695, %v560_v22 }
 0x2fd   :  { %938 = vpow2.f32 %v564_v23 }
 0x2fe   :  { %940 = vpow2.f32 %v562_v24 }
 0x307   :  { %v939_v27 = vpop.eup %938 }
 0x308   :  { %v941_v28 = vpop.eup %940  ;;  %v568_v29 = vsel %vm566_vm2, %v939_v27, %v551_v14 }
 0x309   :  { %571 = vst.msk [vmem:[%s1294_s13 + $0x8] sm:$0xff] %vm569_vm3, %v568_v29  ;;  %v567_v30 = vsel %vm566_vm2, %v941_v28, %v546_v16 }
 0x30a   :  { %570 = vst.msk [vmem:[%s1294_s13] sm:$0xff] %vm569_vm3, %v567_v30 }
 0x30b   :  { %576 = vsyncpa [#allocation3], 1 }

</bundles_post_ra>
